<compile_context>
chip_gen: v7x
topology: tpu7x:2x2x1
jax: 0.10.0
libtpu: 0.0.40
codegen_flags: <defaults>
</compile_context>

<pallas_src>
import jax
import jax.numpy as jnp
from jax import lax
from jax.experimental import pallas as pl
from jax.experimental.pallas import tpu as pltpu

_EPS = 1e-8          # nn.CosineSimilarity default eps
_LANES = 128
_SUBLANES = 8
# Per-input tile element budget (~1 MiB as f32).  Estimated in-flight VMEM:
#   2 inputs x 2 pipeline buffers x E*itemsize   (native tiles)
# + 2 x E*4                                      (f32 cast copies)
# + ~2 x E*4                                     (elementwise product temps)
# + 3 x (E/C)*4                                  (w12 / w1 / w2)
# ~= 9 MiB for f32 inputs, ~7 MiB for bf16 at E = 256K -> safe on v5e's
# 16 MiB default scoped limit and v7x's 64 MiB physical VMEM, and large
# enough (>= 1 MiB tiles) to sit near the HBM roofline.
_MAX_TILE_ELEMS = 256 * 1024


def _cosine_loss_kernel(x_ref, y_ref, out_ref):
    # x_ref, y_ref: (TB, C, TH, 128) blocks in VMEM.  C is a major dim, so the
    # minor (TH, 128) pair is lane-dense with no channel padding and the
    # axis=1 reductions below lower to full-vreg VPU adds.
    # out_ref: (1, 1) f32 in SMEM — one partial sum(cos) per grid step, so
    # there is no revisited accumulator and both grid axes stay "parallel".
    x = x_ref[...].astype(jnp.float32)
    y = y_ref[...].astype(jnp.float32)

    w12 = jnp.sum(x * y, axis=1)   # (TB, TH, 128)
    w1 = jnp.sum(x * x, axis=1)
    w2 = jnp.sum(y * y, axis=1)

    # Matches the reference (ATen-style) cosine_similarity: clamp the product
    # of squared norms with eps^2, then rsqrt (EUP slot) instead of
    # sqrt + full-width divide.
    cos = w12 * lax.rsqrt(jnp.maximum(w1 * w2, jnp.float32(_EPS * _EPS)))
    # Zero-padded spatial positions give w12 = w1 = w2 = 0 -> cos = 0, so they
    # contribute nothing to this partial sum.
    out_ref[0, 0] = jnp.sum(cos)


def _choose_tiles(b, c, nrows):
    """Pick (tb, th, nrows_pad) for input blocks of shape (tb, c, th, 128).

    th is either the full (padded) row extent or a multiple of 8; tb divides
    b exactly.  Padding rows are zeros and contribute cos = 0.
    """
    max_rows = max(_MAX_TILE_ELEMS // (c * _LANES), 1)
    if nrows <= max_rows:
        # Whole spatial extent fits in one tile; only tile the batch.
        th = nrows
        nrows_pad = nrows
        tb_cap = max(min(b, _MAX_TILE_ELEMS // max(c * nrows * _LANES, 1)), 1)
        tb = 1
        for cand in range(tb_cap, 0, -1):
            if b % cand == 0:
                tb = cand
                break
    else:
        # Tile the spatial rows; sublane tiles must be a multiple of 8.
        # TODO(synk): for very large C (c*8*128 elems > budget) a channel-
        # tiled reduction grid axis would be needed to bound VMEM further.
        tb = 1
        th = max((max_rows // _SUBLANES) * _SUBLANES, _SUBLANES)
        nrows_pad = pl.cdiv(nrows, th) * th
    return tb, th, nrows_pad


def cosine_similarity_loss(x, y):
    """x, y: NCHW arrays of identical shape. Returns scalar float32 loss."""
    assert x.shape == y.shape
    b, c, h, w = x.shape
    hw = h * w

    nrows = pl.cdiv(hw, _LANES)
    tb, th, nrows_pad = _choose_tiles(b, c, nrows)
    hw_pad = nrows_pad * _LANES

    # Flattening (H, W) -> HW and splitting HW -> (nrows, 128) only regroups
    # contiguous minor dims (no HBM relayout).  The zero pad (unaligned HW
    # only) is the one copy we accept; padded pixels contribute cos = 0.
    x3 = x.reshape(b, c, hw)
    y3 = y.reshape(b, c, hw)
    if hw_pad != hw:
        pad = ((0, 0), (0, 0), (0, hw_pad - hw))
        x3 = jnp.pad(x3, pad)
        y3 = jnp.pad(y3, pad)
    x4 = x3.reshape(b, c, nrows_pad, _LANES)
    y4 = y3.reshape(b, c, nrows_pad, _LANES)

    num_i = b // tb
    num_j = nrows_pad // th

    partials = pl.pallas_call(
        _cosine_loss_kernel,
        out_shape=jax.ShapeDtypeStruct((num_i, num_j), jnp.float32),
        grid=(num_i, num_j),
        in_specs=[
            pl.BlockSpec((tb, c, th, _LANES), lambda i, j: (i, 0, j, 0)),
            pl.BlockSpec((tb, c, th, _LANES), lambda i, j: (i, 0, j, 0)),
        ],
        out_specs=pl.BlockSpec((1, 1), lambda i, j: (i, j),
                               memory_space=pltpu.SMEM),
        compiler_params=pltpu.CompilerParams(
            # Per-(i, j) partials -> no revisit, so both axes can be sharded
            # across TensorCores (v7x megacore).
            dimension_semantics=("parallel", "parallel"),
            # Explicit headroom; tiles above are budgeted to use ~1/3 of this.
            vmem_limit_bytes=32 * 1024 * 1024,
        ),
    )(x4, y4)

    # loss.mean() = mean(1 - 0.5*cos) = 1 - 0.5 * sum(cos) / (B*HW)
    total_cos = jnp.sum(partials)
    return jnp.float32(1.0) - jnp.float32(0.5) * total_cos / jnp.float32(b * hw)


def _reference(x, y):
    # Pure-JAX reference mirroring the PyTorch module.
    x = x.astype(jnp.float32)
    y = y.astype(jnp.float32)
    w12 = jnp.sum(x * y, axis=1)
    w1 = jnp.sum(x * x, axis=1)
    w2 = jnp.sum(y * y, axis=1)
    cos = w12 / jnp.sqrt(jnp.maximum(w1 * w2, _EPS * _EPS))
    return jnp.mean((1.0 - cos) * 0.5 + 0.5)


if __name__ == "__main__":
    key = jax.random.PRNGKey(0)
    kx, ky = jax.random.split(key)
    # NCHW inputs: batch=2, channels=4, spatial=16x16
    x = jax.random.normal(kx, (2, 4, 16, 16), dtype=jnp.float32)
    y = jax.random.normal(ky, (2, 4, 16, 16), dtype=jnp.float32)

    loss = cosine_similarity_loss(x, y)
    jax.block_until_ready(loss)

    ref = _reference(x, y)
    assert jnp.allclose(loss, ref, rtol=1e-5, atol=1e-5), (loss, ref)
    print("KERNEL_OK")
</pallas_src>

<mosaic_0001>
module attributes {stable_mosaic.version = 11 : i64} {
  func.func @_cosine_loss_kernel(%arg0: i32, %arg1: i32, %arg2: memref<2x4x2x128xf32, #tpu.memory_space<vmem>>, %arg3: memref<2x4x2x128xf32, #tpu.memory_space<vmem>>, %arg4: memref<1x1xf32, #tpu.memory_space<smem>>) attributes {dimension_semantics = [#tpu.dimension_semantics<parallel>, #tpu.dimension_semantics<parallel>], iteration_bounds = array<i64: 1, 1>, scalar_prefetch = 0 : i64, scratch_operands = 0 : i64, tpu.core_type = #tpu.core_type<tc>, window_params = [{transform_indices = @transform_0, window_bounds = array<i64: 2, 4, 2, 128>}, {transform_indices = @transform_1, window_bounds = array<i64: 2, 4, 2, 128>}, {transform_indices = @transform_2, window_bounds = array<i64: 1, 1>}]} {
    %c0 = arith.constant 0 : index
    %c0_0 = arith.constant 0 : index
    %c0_1 = arith.constant 0 : index
    %c0_2 = arith.constant 0 : index
    %0 = vector.load %arg2[%c0, %c0_0, %c0_1, %c0_2] : memref<2x4x2x128xf32, #tpu.memory_space<vmem>>, vector<2x4x2x128xf32>
    %c0_3 = arith.constant 0 : index
    %c0_4 = arith.constant 0 : index
    %c0_5 = arith.constant 0 : index
    %c0_6 = arith.constant 0 : index
    %1 = vector.load %arg3[%c0_3, %c0_4, %c0_5, %c0_6] : memref<2x4x2x128xf32, #tpu.memory_space<vmem>>, vector<2x4x2x128xf32>
    %2 = arith.mulf %0, %1 : vector<2x4x2x128xf32>
    %cst = arith.constant dense<0.000000e+00> : vector<2x2x128xf32>
    %3 = vector.multi_reduction <add>, %2, %cst [1] : vector<2x4x2x128xf32> to vector<2x2x128xf32>
    %4 = arith.mulf %0, %0 : vector<2x4x2x128xf32>
    %cst_7 = arith.constant dense<0.000000e+00> : vector<2x2x128xf32>
    %5 = vector.multi_reduction <add>, %4, %cst_7 [1] : vector<2x4x2x128xf32> to vector<2x2x128xf32>
    %6 = arith.mulf %1, %1 : vector<2x4x2x128xf32>
    %cst_8 = arith.constant dense<0.000000e+00> : vector<2x2x128xf32>
    %7 = vector.multi_reduction <add>, %6, %cst_8 [1] : vector<2x4x2x128xf32> to vector<2x2x128xf32>
    %8 = arith.mulf %5, %7 : vector<2x2x128xf32>
    %cst_9 = arith.constant 1.000000e-16 : f32
    %9 = vector.broadcast %cst_9 : f32 to vector<2x2x128xf32>
    %10 = arith.maximumf %8, %9 : vector<2x2x128xf32>
    %11 = math.rsqrt %10 : vector<2x2x128xf32>
    %12 = arith.mulf %3, %11 : vector<2x2x128xf32>
    %13 = vector.shape_cast %12 : vector<2x2x128xf32> to vector<1x2x2x128xf32>
    %cst_10 = arith.constant dense<0.000000e+00> : vector<1xf32>
    %14 = vector.multi_reduction <add>, %13, %cst_10 [1, 2, 3] : vector<1x2x2x128xf32> to vector<1xf32>
    %15 = vector.shape_cast %14 : vector<1xf32> to vector<1x1x1x1xf32>
    %16 = vector.extract %15[0, 0, 0, 0] : f32 from vector<1x1x1x1xf32>
    %c0_11 = arith.constant 0 : index
    %c0_12 = arith.constant 0 : index
    %17 = memref.load %arg4[%c0_11, %c0_12] : memref<1x1xf32, #tpu.memory_space<smem>>
    memref.store %16, %arg4[%c0_11, %c0_12] : memref<1x1xf32, #tpu.memory_space<smem>>
    return
  }
  func.func @transform_0(%arg0: i32, %arg1: i32) -> (i32, i32, i32, i32) {
    %c0_i32 = arith.constant 0 : i32
    %c0_i32_0 = arith.constant 0 : i32
    %c0_i32_1 = arith.constant 0 : i32
    return %arg0, %c0_i32, %arg1, %c0_i32_0 : i32, i32, i32, i32
  }
  func.func @transform_1(%arg0: i32, %arg1: i32) -> (i32, i32, i32, i32) {
    %c0_i32 = arith.constant 0 : i32
    %c0_i32_0 = arith.constant 0 : i32
    %c0_i32_1 = arith.constant 0 : i32
    return %arg0, %c0_i32, %arg1, %c0_i32_0 : i32, i32, i32, i32
  }
  func.func @transform_2(%arg0: i32, %arg1: i32) -> (i32, i32) {
    %c0_i32 = arith.constant 0 : i32
    return %arg0, %arg1 : i32, i32
  }
}

</mosaic_0001>

<bundles_post_ra>
// kernel: tpu_custom_call.1
= control target key start
LH: loop header
LB: loop body
LE: loop exit
PB: predicated region body
PF: predicated region fallthrough
CT: control target
= control target key end

     0   :  { %7 = vsyncpa [#allocation3], 0  ;;  %s323_s0 = inlined_call_operand.hbm [shape: f32[2,4,2,128], index: 0, kind: input, shape index: {}]   ;;  %s324_s1 = inlined_call_operand.hbm [shape: f32[2,4,2,128], index: 1, kind: input, shape index: {}]   ;;  %s325_s2 = inlined_call_operand.hbm [shape: f32[1,1], index: 2, kind: output, shape index: {}]  }
   0x1   :  { %8 = vsyncpa [#allocation6], 0 }
   0x2   :  { %9 = vsyncpa [#allocation4], 0  ;;  %s231_s9 = smov [#allocation2]   ;;  %s171_s13 = scalar_lea.hbm %s323_s0, 256 }
   0x3   :  { %s15_s10 = sshll.u32 %s231_s9, 4  ;;  %p172_p0 = scmp.ne.s32.totalorder %s323_s0, %s171_s13  ;;  %s16_s10 = int_to_ptr.vmem [resolvable:$true] %s15_s10 }
   0x4   :  { %p175_p1 = scmp.lt.u32.totalorder %s171_s13, %s323_s0 }
   0x6   :  { %p177_p2 = pnand %p175_p1, %p172_p0 }
   0x8   :  { %180 = shalt.err (!%p177_p2)
}
   0x9   :  { %s181_s18 = scalar_lea.vmem %s16_s10, 256  ;;  %p186_p4 = scmp.lt.s32.totalorder %s16_s10, %s16_s10 }
   0xa   :  { %p182_p3 = scmp.ne.s32.totalorder %s16_s10, %s181_s18  ;;  %p187_p5 = scmp.lt.s32.totalorder %s181_s18, %s181_s18 }
   0xc   :  { %p188_p6 = por %p187_p5, %p186_p4 }
   0xe   :  { %p189_p7 = pnand %p188_p6, %p182_p3 }
  0x10   :  { %192 = shalt.err (!%p189_p7)
}
  0x11   :  { %s232_s19 = smov 32   ;;  %s233_s20 = smov 2  }
  0x12   :  { %21 = dma.hbm_to_vmem [thread:$0]  %s323_s0, 256, %s16_s10, [#allocation3], %s232_s19, %s232_s19, %s233_s20  }
  0x13   :  { %s234_s23 = smov [#allocation5]   ;;  %s193_s27 = scalar_lea.hbm %s324_s1, 256 }
  0x14   :  { %s27_s24 = sshll.u32 %s234_s23, 4  ;;  %p194_p8 = scmp.ne.s32.totalorder %s324_s1, %s193_s27  ;;  %s28_s24 = int_to_ptr.vmem [resolvable:$true] %s27_s24 }
  0x15   :  { %p197_p9 = scmp.lt.u32.totalorder %s193_s27, %s324_s1 }
  0x17   :  { %p199_p10 = pnand %p197_p9, %p194_p8 }
  0x19   :  { %202 = shalt.err (!%p199_p10)
}
  0x1a   :  { %s203_s4 = scalar_lea.vmem %s28_s24, 256  ;;  %p208_p12 = scmp.lt.s32.totalorder %s28_s24, %s28_s24 }
  0x1b   :  { %p204_p11 = scmp.ne.s32.totalorder %s28_s24, %s203_s4  ;;  %p209_p13 = scmp.lt.s32.totalorder %s203_s4, %s203_s4 }
  0x1d   :  { %p210_p0 = por %p209_p13, %p208_p12 }
  0x1f   :  { %p211_p1 = pnand %p210_p0, %p204_p11 }
  0x21   :  { %214 = shalt.err (!%p211_p1)
}
  0x22   :  { %33 = dma.hbm_to_vmem [thread:$0]  %s324_s1, 256, %s28_s24, [#allocation6], %s232_s19, %s232_s19, %s233_s20  }
  0x23   :  { %225 = dma.done.wait [#allocation3], 256  }
  0x24   :  { %226 = vsyncadd [#allocation3], 4294967040 }
  0x25   :  { %227 = dma.done.wait [#allocation6], 256  }
  0x26   :  { %228 = vsyncadd [#allocation6], 4294967040  ;;  %v40_v0 = vld [vmem:[#allocation2] sm:$0x3]  ;;  %v41_v1 = vld [vmem:[#allocation2 + $0x2] sm:$0x3] }
  0x27   :  { %v42_v2 = vld [vmem:[#allocation2 + $0x4] sm:$0x3]  ;;  %v44_v3 = vld [vmem:[#allocation2 + $0x8] sm:$0x3]  ;;  %v45_v4 = vld [vmem:[#allocation2 + $0xa] sm:$0x3]  ;;  %v79_v5 = vmul.f32 %v40_v0, %v40_v0  ;;  %v80_v6 = vmul.f32 %v41_v1, %v41_v1 }
  0x28   :  { %v46_v7 = vld [vmem:[#allocation2 + $0xc] sm:$0x3]  ;;  %vm64_vm0 = vcmask 1041408   ;;  %v275_v8 = vld [vmem:[#allocation2 + $0x6] sm:$0x3]  ;;  %v81_v10 = vmul.f32 %v42_v2, %v42_v2  ;;  %v83_v11 = vmul.f32 %v44_v3, %v44_v3  ;;  %v84_v12 = vmul.f32 %v45_v4, %v45_v4  ;;  %s215_s8 = scalar_lea.hbm %s325_s2, 16 }
  0x29   :  { %v48_v9 = vld [vmem:[#allocation5] sm:$0x3]  ;;  %v49_v13 = vld [vmem:[#allocation5 + $0x2] sm:$0x3]  ;;  %v277_v14 = vld [vmem:[#allocation2 + $0xe] sm:$0x3]  ;;  %v85_v16 = vmul.f32 %v46_v7, %v46_v7  ;;  %v82_v22 = vmul.f32 %v275_v8, %v275_v8  ;;  %p216_p2 = scmp.ne.s32.totalorder %s325_s2, %s215_s8  ;;  %p219_p3 = scmp.lt.u32.totalorder %s215_s8, %s325_s2 }
  0x2a   :  { %v50_v15 = vld [vmem:[#allocation5 + $0x4] sm:$0x3]  ;;  %v87_v17 = vsel %vm64_vm0, %v79_v5, 0.0  ;;  %v88_v18 = vsel %vm64_vm0, %v80_v6, 0.0  ;;  %v51_v19 = vld [vmem:[#allocation5 + $0x6] sm:$0x3]  ;;  %v101_v24 = vmul.f32 %v48_v9, %v48_v9  ;;  %v102_v29 = vmul.f32 %v49_v13, %v49_v13 }
  0x2b   :  { %v52_v20 = vld [vmem:[#allocation5 + $0x8] sm:$0x3]  ;;  %v53_v21 = vld [vmem:[#allocation5 + $0xa] sm:$0x3]  ;;  %v89_v23 = vadd.f32 %v88_v18, %v87_v17  ;;  %v54_v25 = vld [vmem:[#allocation5 + $0xc] sm:$0x3]  ;;  %v86_v31 = vmul.f32 %v277_v14, %v277_v14  ;;  %v103_v34 = vmul.f32 %v50_v15, %v50_v15  ;;  %v104_v35 = vmul.f32 %v51_v19, %v51_v19  ;;  %p221_p4 = pnand %p219_p3, %p216_p2 }
  0x2c   :  { %v90_v26 = vsel %vm64_vm0, %v81_v10, 0.0  ;;  %v94_v27 = vsel %vm64_vm0, %v83_v11, 0.0  ;;  %v95_v28 = vsel %vm64_vm0, %v84_v12, 0.0  ;;  %v55_v30 = vld [vmem:[#allocation5 + $0xe] sm:$0x3]  ;;  %v97_v33 = vsel %vm64_vm0, %v85_v16, 0.0 }
  0x2d   :  { %v96_v32 = vadd.f32 %v95_v28, %v94_v27  ;;  %v105_v36 = vmul.f32 %v52_v20, %v52_v20  ;;  %v91_v37 = vadd.f32 %v90_v26, %v89_v23  ;;  %v92_v38 = vsel %vm64_vm0, %v82_v22, 0.0 }
  0x2e   :  { %v106_v39 = vmul.f32 %v53_v21, %v53_v21  ;;  %v107_v40 = vmul.f32 %v54_v25, %v54_v25  ;;  %v108_v41 = vmul.f32 %v55_v30, %v55_v30  ;;  %v109_v42 = vsel %vm64_vm0, %v101_v24, 0.0 }
  0x2f   :  { %v110_v43 = vsel %vm64_vm0, %v102_v29, 0.0  ;;  %v112_v44 = vsel %vm64_vm0, %v103_v34, 0.0  ;;  %v56_v45 = vmul.f32 %v48_v9, %v40_v0  ;;  %v98_v46 = vadd.f32 %v97_v33, %v96_v32 }
  0x30   :  { %v111_v47 = vadd.f32 %v110_v43, %v109_v42  ;;  %v116_v48 = vsel %vm64_vm0, %v105_v36, 0.0  ;;  %v99_v49 = vsel %vm64_vm0, %v86_v31, 0.0  ;;  %v114_v50 = vsel %vm64_vm0, %v104_v35, 0.0 }
  0x31   :  { %v117_v51 = vsel %vm64_vm0, %v106_v39, 0.0  ;;  %v119_v52 = vsel %vm64_vm0, %v107_v40, 0.0  ;;  %v57_v53 = vmul.f32 %v49_v13, %v41_v1  ;;  %v93_v54 = vadd.f32 %v92_v38, %v91_v37 }
  0x32   :  { %v113_v55 = vadd.f32 %v112_v44, %v111_v47  ;;  %v118_v56 = vadd.f32 %v117_v51, %v116_v48  ;;  %v60_v57 = vmul.f32 %v52_v20, %v44_v3  ;;  %v121_v58 = vsel %vm64_vm0, %v108_v41, 0.0 }
  0x33   :  { %v61_v59 = vmul.f32 %v53_v21, %v45_v4  ;;  %v100_v60 = vadd.f32 %v99_v49, %v98_v46  ;;  %v58_v63 = vmul.f32 %v50_v15, %v42_v2  ;;  %v65_v0 = vsel %vm64_vm0, %v56_v45, 0.0 }
  0x34   :  { %v115_v61 = vadd.f32 %v114_v50, %v113_v55  ;;  %v120_v62 = vadd.f32 %v119_v52, %v118_v56  ;;  %v66_v5 = vsel %vm64_vm0, %v57_v53, 0.0  ;;  %v62_v10 = vmul.f32 %v54_v25, %v46_v7 }
  0x35   :  { %v72_v1 = vsel %vm64_vm0, %v60_v57, 0.0  ;;  %v73_v11 = vsel %vm64_vm0, %v61_v59, 0.0  ;;  %v67_v13 = vadd.f32 %v66_v5, %v65_v0  ;;  %v59_v4 = vmul.f32 %v51_v19, %v275_v8 }
  0x36   :  { %v122_v6 = vadd.f32 %v121_v58, %v120_v62  ;;  %v123_v9 = vmul.f32 %v115_v61, %v93_v54  ;;  %v68_v16 = vsel %vm64_vm0, %v58_v63, 0.0  ;;  %v74_v2 = vadd.f32 %v73_v11, %v72_v1 }
  0x37   :  { %v63_v15 = vmul.f32 %v55_v30, %v277_v14  ;;  %v75_v18 = vsel %vm64_vm0, %v62_v10, 0.0  ;;  %v69_v7 = vadd.f32 %v68_v16, %v67_v13  ;;  %v70_v20 = vsel %vm64_vm0, %v59_v4, 0.0 }
  0x38   :  { %v124_v12 = vmul.f32 %v122_v6, %v100_v60  ;;  %v125_v3 = vmax.f32 %v123_v9, 1e-16  ;;  %v76_v21 = vadd.f32 %v75_v18, %v74_v2 }
  0x39   :  { %v77_v22 = vsel %vm64_vm0, %v63_v15, 0.0  ;;  %v71_v23 = vadd.f32 %v70_v20, %v69_v7 }
  0x3a   :  { %v126_v17 = vmax.f32 %v124_v12, 1e-16  ;;  %167 = vrsqrt.f32 %v125_v3  ;;  %v78_v24 = vadd.f32 %v77_v22, %v76_v21 }
  0x3c   :  { %169 = vrsqrt.f32 %v126_v17 }
  0x44   :  { %v168_v25 = vpop.eup %167 }
  0x45   :  { %v129_v8 = vmul.f32 %v168_v25, %v71_v23 }
  0x46   :  { %v170_v19 = vpop.eup %169 }
  0x47   :  { %v130_v26 = vmul.f32 %v170_v19, %v78_v24  ;;  %v131_v27 = vsel %vm64_vm0, %v129_v8, 0.0 }
  0x49   :  { %v132_v28 = vsel %vm64_vm0, %v130_v26, 0.0 }
  0x4a   :  { %v133_v14 = vadd.f32 %v132_v28, %v131_v27 }
  0x4c   :  { %134 = vadd.xlane.f32.xlu0 %v133_v14 }
  0xd9   :  { %v135_v29 = vpop.xlane.xlu0 %134 }
  0xda   :  { %v136_v30 = vrot.slane %v135_v29, 4 }
  0xdc   :  { %v137_v31 = vadd.f32 %v136_v30, %v135_v29 }
  0xde   :  { %v138_v32 = vrot.slane %v137_v31, 2 }
  0xe0   :  { %v139_v33 = vadd.f32 %v138_v32, %v137_v31 }
  0xe2   :  { %v140_v34 = vrot.slane %v139_v33, 1 }
  0xe4   :  { %v141_v35 = vadd.f32 %v140_v34, %v139_v33 }
  0xe6   :  { %160 = vpush %v141_v35 }
 0x117   :  { %s161_s1 = spop %160 }
 0x118   :  { %144 = sst [smem:[#allocation7]] %s161_s1 }
 0x119   :  { %224 = shalt.err (!%p221_p4)
}
 0x11a   :  { %s235_s13 = smov [#allocation7]  }
 0x11b   :  { %152 = dma.smem_to_hbm %s235_s13, 16, %s325_s2, [#allocation4]  }
 0x11c   :  { %229 = dma.done.wait [#allocation4], 16  }
 0x11d   :  { %230 = vsyncadd [#allocation4], 4294967280 }
 0x11e   :  { %156 = sfence }
 0x11f   :  { %157 = vsyncpa [#allocation3], 1 }
 0x120   :  { %158 = vsyncpa [#allocation6], 1 }
 0x121   :  { %159 = vsyncpa [#allocation4], 1 }

</bundles_post_ra>
